<compile_context>
chip_gen: v6e
topology: v6e:2x2x1
jax: 0.10.0
libtpu: 0.0.40
codegen_flags: <defaults>
</compile_context>

<pallas_src>
import functools
import math

import jax
import jax.numpy as jnp
from jax.experimental import pallas as pl
from jax.experimental.pallas import tpu as pltpu


def _round_up(x, m):
    return ((x + m - 1) // m) * m


def _rmsnorm_kernel(x_ref, g_ref, o_ref, *, eps):
    # x_ref: (tile, d_model); g_ref: (1, d_model) f32, VMEM-resident.
    xf = x_ref[...].astype(jnp.float32)
    ms = jnp.mean(xf * xf, axis=-1, keepdims=True)        # f32 accumulation
    scale = jax.lax.rsqrt(ms + eps)                        # (tile, 1)
    o_ref[...] = (xf * scale * g_ref[...]).astype(o_ref.dtype)


def _rmsnorm_fold_kernel(x_ref, g_ref, seg_ref, o_ref, *, eps, inv_d):
    # x_ref: (tile, fold*d_model); each kernel row packs `fold` logical rows
    # along the lane axis.  seg_ref is a constant block-diagonal 0/1 matrix:
    # one MXU matmul produces, at every lane j, the sum of x^2 over the
    # segment containing j (f32-exact via precision=HIGHEST).
    xf = x_ref[...].astype(jnp.float32)
    x2 = xf * xf
    seg_sum = jnp.dot(x2, seg_ref[...],
                      preferred_element_type=jnp.float32,
                      precision=jax.lax.Precision.HIGHEST)
    scale = jax.lax.rsqrt(seg_sum * inv_d + eps)           # already lane-broadcast
    o_ref[...] = (xf * scale * g_ref[...]).astype(o_ref.dtype)


def _pick_tiling(rows_f, lane_width, itemsize, sublane, extra_bytes):
    """Row tile + scoped-VMEM request, sized from the real working set."""
    # Per tile row: double-buffered input + double-buffered output (same
    # dtype) + ~2 f32 temporaries inside the kernel body.
    per_row = lane_width * (4 * itemsize + 2 * 4)
    budget = 24 << 20                                     # working-set target
    cap = max(sublane, ((budget // per_row) // sublane) * sublane)
    tile = min(512, cap)                                  # 512 ~ HBM roofline already
    if rows_f >= 4 * sublane:
        # >= 4 grid steps when there is enough work: >= 2 steps per
        # TensorCore on v7x so each core still double-buffers.
        tile = min(tile, _round_up(pl.cdiv(rows_f, 4), sublane))
    tile = max(sublane, min(tile, _round_up(rows_f, sublane)))
    working = tile * per_row + extra_bytes
    # Right-sized scoped VMEM, hard-clamped well under v7x's 64 MiB/TC.
    vmem_limit = int(min(48 << 20, max(2 * working + (4 << 20), 16 << 20)))
    return tile, vmem_limit


def rmsnorm(x, gain, eps=1e-5):
    """RMSNorm over the last axis of x, scaled by gain of shape (d_model,)."""
    d_model = x.shape[-1]
    assert gain.shape == (d_model,)
    lead = x.shape[:-1]
    rows = int(math.prod(lead)) if lead else 1
    x2d = x.reshape(rows, d_model)

    itemsize = jnp.dtype(x.dtype).itemsize
    sublane = {4: 8, 2: 16, 1: 32}.get(itemsize, 8)

    # Lane-dense fold for non-128-aligned d_model (keeps stores unmasked).
    fold = 1
    if d_model % 128 != 0:
        f = 128 // math.gcd(d_model, 128)   # smallest f with f*d_model % 128 == 0
        if f * d_model <= 1024 and f <= 16:
            fold = f

    gain_f32 = gain.astype(jnp.float32)     # pre-cast: no per-step cast in-kernel
    if fold > 1:
        tail = (-rows) % fold
        if tail:
            # Tiny tail-only pad (< fold rows); zero rows give rsqrt(eps), finite.
            x2d = jnp.pad(x2d, ((0, tail), (0, 0)))
        rows_p = rows + tail
        lane_width = fold * d_model
        rows_f = rows_p // fold
        x2d = x2d.reshape(rows_f, lane_width)
        g_row = jnp.tile(gain_f32, fold).reshape(1, lane_width)
    else:
        rows_p = rows
        lane_width = d_model
        rows_f = rows
        g_row = gain_f32.reshape(1, lane_width)

    # Tiny-input safety pad only: guarantee at least one full sublane tile.
    rows_run = rows_f
    if rows_f < sublane:
        x2d = jnp.pad(x2d, ((0, sublane - rows_f), (0, 0)))
        rows_run = sublane

    seg_bytes = lane_width * lane_width * 4 if fold > 1 else 0
    tile, vmem_limit = _pick_tiling(rows_run, lane_width, itemsize, sublane,
                                    extra_bytes=seg_bytes + lane_width * 4)
    grid = (pl.cdiv(rows_run, tile),)       # partial last block handled by Pallas

    x_spec = pl.BlockSpec((tile, lane_width), lambda i: (i, 0))
    g_spec = pl.BlockSpec((1, lane_width), lambda i: (0, 0))     # VMEM-resident
    o_spec = pl.BlockSpec((tile, lane_width), lambda i: (i, 0))

    if fold > 1:
        lane_seg = jnp.arange(lane_width, dtype=jnp.int32) // d_model
        seg_mat = (lane_seg[:, None] == lane_seg[None, :]).astype(jnp.float32)
        kernel = functools.partial(_rmsnorm_fold_kernel, eps=float(eps),
                                   inv_d=1.0 / d_model)
        in_specs = [x_spec, g_spec,
                    pl.BlockSpec((lane_width, lane_width), lambda i: (0, 0))]
        args = (x2d, g_row, seg_mat)
    else:
        kernel = functools.partial(_rmsnorm_kernel, eps=float(eps))
        in_specs = [x_spec, g_spec]
        args = (x2d, g_row)

    out = pl.pallas_call(
        kernel,
        out_shape=jax.ShapeDtypeStruct((rows_run, lane_width), x.dtype),
        grid_spec=pltpu.PrefetchScalarGridSpec(
            num_scalar_prefetch=0,
            grid=grid,
            in_specs=in_specs,
            out_specs=o_spec,
        ),
        compiler_params=pltpu.CompilerParams(
            dimension_semantics=("parallel",),
            vmem_limit_bytes=vmem_limit,
        ),
    )(*args)

    if rows_run != rows_f:
        out = out[:rows_f]
    if fold > 1:
        out = out.reshape(rows_p, d_model)
        if rows_p != rows:
            out = out[:rows]
    return out.reshape(*lead, d_model)


def _reference(x, gain, eps):
    rms = jnp.sqrt(jnp.mean(x * x, axis=-1, keepdims=True) + eps)
    return gain * (x / rms)


if __name__ == "__main__":
    eps = 1e-5

    # Primary test: shapes implied by the module (small d_model exercises the
    # lane-dense folded / MXU-segment-sum path).
    batch, seq, d_model = 2, 8, 32
    x = jax.random.normal(jax.random.PRNGKey(0), (batch, seq, d_model), dtype=jnp.float32)
    gain = jnp.ones((d_model,), dtype=jnp.float32)   # nn.Parameter(torch.ones(d_model))
    y = rmsnorm(x, gain, eps=eps)
    jax.block_until_ready(y)
    assert y.shape == x.shape and y.dtype == x.dtype
    assert jnp.allclose(y, _reference(x, gain, eps), atol=1e-5, rtol=1e-5)

    # 128-aligned d_model: plain path, >=4 grid steps, non-trivial gain.
    d2 = 128
    x2 = jax.random.normal(jax.random.PRNGKey(1), (2, 16, d2), dtype=jnp.float32)
    g2 = jax.random.normal(jax.random.PRNGKey(2), (d2,), dtype=jnp.float32)
    y2 = rmsnorm(x2, g2, eps=eps)
    jax.block_until_ready(y2)
    assert y2.shape == x2.shape and y2.dtype == x2.dtype
    assert jnp.allclose(y2, _reference(x2, g2, eps), atol=1e-5, rtol=1e-5)

    # Non-tile-multiple rows: exercises the no-pad partial-last-block path
    # (masked writeback; garbage OOB rows cannot leak into valid rows).
    x3 = jax.random.normal(jax.random.PRNGKey(3), (3, 20, d2), dtype=jnp.float32)
    y3 = rmsnorm(x3, g2, eps=eps)
    jax.block_until_ready(y3)
    assert y3.shape == x3.shape and y3.dtype == x3.dtype
    assert jnp.allclose(y3, _reference(x3, g2, eps), atol=1e-5, rtol=1e-5)

    print("KERNEL_OK")
</pallas_src>

<mosaic_0001>
module attributes {stable_mosaic.version = 11 : i64} {
  func.func @_rmsnorm_fold_kernel(%arg0: i32, %arg1: memref<8x128xf32, #tpu.memory_space<vmem>>, %arg2: memref<1x128xf32, #tpu.memory_space<vmem>>, %arg3: memref<128x128xf32, #tpu.memory_space<vmem>>, %arg4: memref<8x128xf32, #tpu.memory_space<vmem>>) attributes {dimension_semantics = [#tpu.dimension_semantics<parallel>], iteration_bounds = array<i64: 1>, scalar_prefetch = 0 : i64, scratch_operands = 0 : i64, tpu.core_type = #tpu.core_type<tc>, window_params = [{transform_indices = @transform_0, window_bounds = array<i64: 8, 128>}, {pipeline_mode = #tpu.pipeline_mode<synchronous>, transform_indices = @transform_1, window_bounds = array<i64: 1, 128>}, {pipeline_mode = #tpu.pipeline_mode<synchronous>, transform_indices = @transform_2, window_bounds = array<i64: 128, 128>}, {transform_indices = @transform_3, window_bounds = array<i64: 8, 128>}]} {
    %c0 = arith.constant 0 : index
    %c0_0 = arith.constant 0 : index
    %0 = vector.load %arg1[%c0, %c0_0] : memref<8x128xf32, #tpu.memory_space<vmem>>, vector<8x128xf32>
    %1 = arith.mulf %0, %0 : vector<8x128xf32>
    %c0_1 = arith.constant 0 : index
    %c0_2 = arith.constant 0 : index
    %2 = vector.load %arg3[%c0_1, %c0_2] : memref<128x128xf32, #tpu.memory_space<vmem>>, vector<128x128xf32>
    %cst = arith.constant dense<0.000000e+00> : vector<8x128xf32>
    %3 = tpu.matmul %1, %2, %cst {dimension_numbers = #tpu.dot_dimension_numbers<[1], [0], [0], [1], [0, 0, 1, 1], [], []>, precision = #tpu.contract_precision<fp32>} : vector<8x128xf32>, vector<128x128xf32>, vector<8x128xf32> -> vector<8x128xf32>
    %cst_3 = arith.constant 3.125000e-02 : f32
    %4 = vector.broadcast %cst_3 : f32 to vector<8x128xf32>
    %5 = arith.mulf %3, %4 : vector<8x128xf32>
    %cst_4 = arith.constant 9.99999974E-6 : f32
    %6 = vector.broadcast %cst_4 : f32 to vector<8x128xf32>
    %7 = arith.addf %5, %6 : vector<8x128xf32>
    %8 = math.rsqrt %7 : vector<8x128xf32>
    %9 = arith.mulf %0, %8 : vector<8x128xf32>
    %c0_5 = arith.constant 0 : index
    %c0_6 = arith.constant 0 : index
    %10 = vector.load %arg2[%c0_5, %c0_6] : memref<1x128xf32, #tpu.memory_space<vmem>>, vector<1x128xf32>
    %11 = vector.broadcast %10 : vector<1x128xf32> to vector<8x128xf32>
    %12 = arith.mulf %9, %11 : vector<8x128xf32>
    %c0_7 = arith.constant 0 : index
    %c0_8 = arith.constant 0 : index
    %13 = vector.load %arg4[%c0_7, %c0_8] : memref<8x128xf32, #tpu.memory_space<vmem>>, vector<8x128xf32>
    tpu.vector_store %arg4[%c0_7, %c0_8], %12 {strides = array<i32>} : memref<8x128xf32, #tpu.memory_space<vmem>>, vector<8x128xf32>,
    return
  }
  func.func @transform_0(%arg0: i32) -> (i32, i32) {
    %c0_i32 = arith.constant 0 : i32
    %c0_i32_0 = arith.constant 0 : i32
    return %arg0, %c0_i32 : i32, i32
  }
  func.func @transform_1(%arg0: i32) -> (i32, i32) {
    %c0_i32 = arith.constant 0 : i32
    %c0_i32_0 = arith.constant 0 : i32
    %c0_i32_1 = arith.constant 0 : i32
    return %c0_i32, %c0_i32_0 : i32, i32
  }
  func.func @transform_2(%arg0: i32) -> (i32, i32) {
    %c0_i32 = arith.constant 0 : i32
    %c0_i32_0 = arith.constant 0 : i32
    %c0_i32_1 = arith.constant 0 : i32
    return %c0_i32, %c0_i32_0 : i32, i32
  }
  func.func @transform_3(%arg0: i32) -> (i32, i32) {
    %c0_i32 = arith.constant 0 : i32
    %c0_i32_0 = arith.constant 0 : i32
    return %arg0, %c0_i32 : i32, i32
  }
}

</mosaic_0001>

<bundles_post_ra>
// kernel: tpu_custom_call.1
= control target key start
LH: loop header
LB: loop body
LE: loop exit
PB: predicated region body
PF: predicated region fallthrough
CT: control target
= control target key end

     0   :  { %8 = vsyncpa [#allocation3], 0  ;;  %s1524_s0 = inlined_call_operand.hbm [shape: f32[8,128], index: 0, kind: input, shape index: {}]   ;;  %s1525_s1 = inlined_call_operand.vmem [shape: f32[1,128], index: 1, kind: input, shape index: {}]   ;;  %s1526_s2 = inlined_call_operand.hbm [shape: f32[128,128], index: 2, kind: input, shape index: {}]   ;;  %s1527_s3 = inlined_call_operand.hbm [shape: f32[8,128], index: 3, kind: output, shape index: {}]  }
   0x1   :  { %9 = vsyncpa [#allocation6], 0 }
   0x2   :  { %10 = vsyncpa [#allocation4], 0  ;;  %s1117_s12 = smov [#allocation2]   ;;  %s1118_s14 = smov [#allocation5]  }
   0x3   :  { %s17_s13 = sshll.u32 %s1117_s12, 4  ;;  %s28_s15 = sshll.u32 %s1118_s14, 4  ;;  %s18_s13 = int_to_ptr.vmem [resolvable:$true] %s17_s13  ;;  %s29_s15 = int_to_ptr.vmem [resolvable:$true] %s28_s15 }
   0x4   :  { %s1059_s16 = scalar_lea.vmem %s18_s13, 128  ;;  %p1064_p1 = scmp.lt.s32.totalorder %s18_s13, %s18_s13 }
   0x5   :  { %p1060_p0 = scmp.ne.s32.totalorder %s18_s13, %s1059_s16  ;;  %p1065_p2 = scmp.lt.s32.totalorder %s1059_s16, %s1059_s16 }
   0x7   :  { %p1066_p3 = por %p1065_p2, %p1064_p1 }
   0x9   :  { %p1067_p4 = pnand %p1066_p3, %p1060_p0 }
   0xb   :  { %1070 = shalt.err (!%p1067_p4)
}
   0xc   :  { %20 = dma.hbm_to_vmem [thread:$0]  %s1524_s0, 128, %s18_s13, [#allocation3]  }
   0xd   :  { %s1079_s19 = scalar_lea.vmem %s29_s15, 2048  ;;  %p1084_p6 = scmp.lt.s32.totalorder %s29_s15, %s29_s15 }
   0xe   :  { %p1080_p5 = scmp.ne.s32.totalorder %s29_s15, %s1079_s19  ;;  %p1085_p7 = scmp.lt.s32.totalorder %s1079_s19, %s1079_s19 }
  0x10   :  { %p1086_p8 = por %p1085_p7, %p1084_p6 }
  0x12   :  { %p1087_p9 = pnand %p1086_p8, %p1080_p5 }
  0x14   :  { %1090 = shalt.err (!%p1087_p9)
}
  0x15   :  { %s1119_s20 = smov 128   ;;  %s1120_s21 = smov 8  }
  0x16   :  { %34 = dma.hbm_to_vmem [thread:$0]  %s1526_s2, 2048, %s29_s15, [#allocation6], %s1119_s20, %s1119_s20, %s1120_s21  }
  0x17   :  { %1111 = dma.done.wait [#allocation3], 128  }
  0x18   :  { %1112 = vsyncadd [#allocation3], 4294967168 }
  0x19   :  { %1113 = dma.done.wait [#allocation6], 2048  }
  0x1a   :  { %1114 = vsyncadd [#allocation6], 4294965248  ;;  %v1121_v0 = vmov 0.0   ;;  %vm1122_vm0 = vmmov 0   ;;  %v58_v1 = vld [vmem:[#allocation5 + $0x78] sm:$0xff]  ;;  %v57_v2 = vld [vmem:[#allocation5 + $0x70] sm:$0xff] }
  0x1b   :  { %832 = vmatprep.subr.mxu0 %v1121_v0  ;;  %867 = vmatprep.subr.mxu1 %v1121_v0  ;;  %v56_v3 = vld [vmem:[#allocation5 + $0x68] sm:$0xff]  ;;  %v1156_v4 = vand.u32 4294901760, %v58_v1  ;;  %v1158_v5 = vand.u32 4294901760, %v57_v2  ;;  %v55_v7 = vld [vmem:[#allocation5 + $0x60] sm:$0xff]  ;;  %v54_v8 = vld [vmem:[#allocation5 + $0x58] sm:$0xff]  ;;  %s1123_s24 = smov [#allocation7]  }
  0x1c   :  { %864 = vmatprep.mubr.msk.f32.mxu0 %vm1122_vm0, %v1121_v0  ;;  %899 = vmatprep.mubr.msk.f32.mxu1 %vm1122_vm0, %v1121_v0  ;;  %v1160_v6 = vand.u32 4294901760, %v56_v3  ;;  %v53_v9 = vld [vmem:[#allocation5 + $0x50] sm:$0xff]  ;;  %v1162_v10 = vand.u32 4294901760, %v55_v7  ;;  %v1164_v11 = vand.u32 4294901760, %v54_v8  ;;  %v52_v13 = vld [vmem:[#allocation5 + $0x48] sm:$0xff]  ;;  %v51_v14 = vld [vmem:[#allocation5 + $0x40] sm:$0xff] }
  0x1d   :  { %v1166_v12 = vand.u32 4294901760, %v53_v9  ;;  %833 = vmatpush3.msra.mxu0 %v1156_v4  ;;  %v1170_v15 = vsub.f32 %v58_v1, %v1156_v4  ;;  %v1173_v16 = vsub.f32 %v57_v2, %v1158_v5  ;;  %v1175_v17 = vand.u32 4294901760, %v52_v13  ;;  %v50_v19 = vld [vmem:[#allocation5 + $0x38] sm:$0xff]  ;;  %v49_v26 = vld [vmem:[#allocation5 + $0x30] sm:$0xff]  ;;  %v48_v34 = vld [vmem:[#allocation5 + $0x28] sm:$0xff]  ;;  %s719_s25 = sshll.u32 %s1123_s24, 4  ;;  %s720_s25 = int_to_ptr.vmem [resolvable:$true] %s719_s25 }
  0x1e   :  { %v1178_v18 = vsub.f32 %v56_v3, %v1160_v6  ;;  %834 = vmatprep.subr.mxu0 %v1121_v0  ;;  %v1182_v20 = vsub.f32 %v55_v7, %v1162_v10  ;;  %v1185_v21 = vsub.f32 %v54_v8, %v1164_v11  ;;  %v1191_v25 = vand.u32 4294901760, %v51_v14  ;;  %v47_v41 = vld [vmem:[#allocation5 + $0x20] sm:$0xff]  ;;  %v1236_v48 = vld [vmem:[#allocation2] sm:$0xff]  ;;  %v45_v54 = vld [vmem:[#allocation5 + $0x10] sm:$0xff]  ;;  %s1091_s26 = scalar_lea.vmem %s720_s25, 128  ;;  %p1096_p11 = scmp.lt.s32.totalorder %s720_s25, %s720_s25 }
  0x1f   :  { %835 = vmatpush3.msra.mxu0 %v1158_v5  ;;  %v153_v22 = vand.u32 4294901760, %v1170_v15  ;;  %v160_v23 = vand.u32 4294901760, %v1173_v16  ;;  %v1195_v28 = vand.u32 4294901760, %v50_v19  ;;  %v1199_v30 = vsub.f32 %v53_v9, %v1166_v12  ;;  %v46_v50 = vld [vmem:[#allocation5 + $0x18] sm:$0xff]  ;;  %v44_v61 = vld [vmem:[#allocation5 + $0x8] sm:$0xff]  ;;  %v43_v8 = vld [vmem:[#allocation5] sm:$0xff]  ;;  %p1092_p10 = scmp.ne.s32.totalorder %s720_s25, %s1091_s26  ;;  %p1097_p12 = scmp.lt.s32.totalorder %s1091_s26, %s1091_s26 }
  0x20   :  { %v167_v24 = vand.u32 4294901760, %v1178_v18  ;;  %836 = vmatprep.subr.mxu0 %v1121_v0  ;;  %v174_v27 = vand.u32 4294901760, %v1182_v20  ;;  %v181_v29 = vand.u32 4294901760, %v1185_v21  ;;  %v1212_v35 = vsub.f32 %v52_v13, %v1175_v17 }
  0x21   :  { %837 = vmatpush3.msra.mxu0 %v1160_v6  ;;  %v154_v31 = vsub.f32 %v1170_v15, %v153_v22  ;;  %v161_v32 = vsub.f32 %v1173_v16, %v160_v23  ;;  %v1215_v36 = vand.u32 4294901760, %v49_v26  ;;  %v188_v40 = vand.u32 4294901760, %v1199_v30  ;;  %p1098_p13 = por %p1097_p12, %p1096_p11 }
  0x22   :  { %v168_v33 = vsub.f32 %v1178_v18, %v167_v24  ;;  %838 = vmatprep.subr.mxu0 %v1121_v0  ;;  %v175_v39 = vsub.f32 %v1182_v20, %v174_v27  ;;  %v1223_v42 = vand.u32 4294901760, %v48_v34  ;;  %v1226_v43 = vsub.f32 %v51_v14, %v1191_v25 }
  0x23   :  { %839 = vmatpush3.msra.mxu0 %v1162_v10  ;;  %v155_v37 = vand.u32 4294901760, %v154_v31  ;;  %v162_v38 = vand.u32 4294901760, %v161_v32  ;;  %v182_v45 = vsub.f32 %v1185_v21, %v181_v29  ;;  %v195_v46 = vand.u32 4294901760, %v1212_v35  ;;  %p1099_p0 = pnand %p1098_p13, %p1092_p10 }
  0x24   :  { %840 = vmatprep.subr.mxu0 %v1121_v0  ;;  %v169_v44 = vand.u32 4294901760, %v168_v33  ;;  %v1234_v47 = vsub.f32 %v50_v19, %v1195_v28  ;;  %v1240_v49 = vand.u32 4294901760, %v47_v41  ;;  %v176_v51 = vand.u32 4294901760, %v175_v39 }
  0x25   :  { %841 = vmatpush3.msra.mxu0 %v1164_v11  ;;  %868 = vmatpush3.msra.mxu1 %v155_v37  ;;  %v189_v52 = vsub.f32 %v1199_v30, %v188_v40  ;;  %v202_v53 = vand.u32 4294901760, %v1226_v43  ;;  %v1248_v55 = vsub.f32 %v49_v26, %v1215_v36  ;;  %v42_v57 = vmul.f32 %v1236_v48, %v1236_v48 }
  0x26   :  { %842 = vmatprep.subr.mxu0 %v1121_v0  ;;  %869 = vmatprep.subr.mxu1 %v1121_v0  ;;  %v209_v56 = vand.u32 4294901760, %v1234_v47  ;;  %v183_v58 = vand.u32 4294901760, %v182_v45  ;;  %v196_v59 = vsub.f32 %v1212_v35, %v195_v46  ;;  %v1259_v60 = vand.u32 4294901760, %v46_v50 }
  0x27   :  { %843 = vmatpush3.msra.mxu0 %v1166_v12  ;;  %870 = vmatpush3.msra.mxu1 %v162_v38  ;;  %v1262_v62 = vsub.f32 %v48_v34, %v1223_v42  ;;  %v1266_v63 = vand.u32 4294901760, %v45_v54  ;;  %v1268_v1 = vand.u32 4294901760, %v42_v57  ;;  %v190_v2 = vand.u32 4294901760, %v189_v52 }
  0x28   :  { %844 = vmatprep.subr.mxu0 %v1121_v0  ;;  %871 = vmatprep.subr.mxu1 %v1121_v0  ;;  %v203_v3 = vsub.f32 %v1226_v43, %v202_v53  ;;  %v216_v7 = vand.u32 4294901760, %v1248_v55  ;;  %v1276_v9 = vsub.f32 %v47_v41, %v1240_v49  ;;  %v210_v13 = vsub.f32 %v1234_v47, %v209_v56 }
  0x29   :  { %845 = vmatpush3.msra.mxu0 %v1175_v17  ;;  %872 = vmatpush3.msra.mxu1 %v169_v44  ;;  %v1283_v14 = vand.u32 4294901760, %v44_v61  ;;  %v197_v19 = vand.u32 4294901760, %v196_v59  ;;  %v223_v26 = vand.u32 4294901760, %v1262_v62  ;;  %v1288_v31 = vsub.f32 %v42_v57, %v1268_v1 }
  0x2a   :  { %846 = vmatprep.subr.mxu0 %v1121_v0  ;;  %873 = vmatprep.subr.mxu1 %v1121_v0  ;;  %v1291_v32 = vsub.f32 %v46_v50, %v1259_v60  ;;  %v1295_v33 = vand.u32 4294901760, %v43_v8  ;;  %v204_v34 = vand.u32 4294901760, %v203_v3  ;;  %v217_v37 = vsub.f32 %v1248_v55, %v216_v7 }
  0x2b   :  { %847 = vmatpush3.msra.mxu0 %v1191_v25  ;;  %874 = vmatpush3.msra.mxu1 %v176_v51  ;;  %v230_v38 = vand.u32 4294901760, %v1276_v9  ;;  %v1303_v39 = vsub.f32 %v45_v54, %v1266_v63  ;;  %v211_v41 = vand.u32 4294901760, %v210_v13  ;;  %v224_v44 = vsub.f32 %v1262_v62, %v223_v26 }
  0x2c   :  { %848 = vmatprep.subr.mxu0 %v1121_v0  ;;  %875 = vmatprep.subr.mxu1 %v1121_v0  ;;  %v142_v45 = vand.u32 4294901760, %v1288_v31  ;;  %v237_v50 = vand.u32 4294901760, %v1291_v32  ;;  %v1314_v51 = vsub.f32 %v44_v61, %v1283_v14  ;;  %v218_v52 = vand.u32 4294901760, %v217_v37 }
  0x2d   :  { %849 = vmatpush3.msra.mxu0 %v1195_v28  ;;  %876 = vmatpush3.msra.mxu1 %v183_v58  ;;  %v231_v54 = vsub.f32 %v1276_v9, %v230_v38  ;;  %v244_v57 = vand.u32 4294901760, %v1303_v39  ;;  %v1324_v58 = vsub.f32 %v43_v8, %v1295_v33  ;;  %v225_v59 = vand.u32 4294901760, %v224_v44 }
  0x2e   :  { %850 = vmatprep.subr.mxu0 %v1121_v0  ;;  %877 = vmatprep.subr.mxu1 %v1121_v0  ;;  %v143_v61 = vsub.f32 %v1288_v31, %v142_v45  ;;  %v251_v3 = vand.u32 4294901760, %v1314_v51 }
  0x2f   :  { %851 = vmatpush3.msra.mxu0 %v1215_v36  ;;  %878 = vmatpush3.msra.mxu1 %v190_v2  ;;  %v238_v2 = vsub.f32 %v1291_v32, %v237_v50  ;;  %v232_v8 = vand.u32 4294901760, %v231_v54  ;;  %v245_v13 = vsub.f32 %v1303_v39, %v244_v57 }
  0x30   :  { %852 = vmatprep.subr.mxu0 %v1121_v0  ;;  %879 = vmatprep.subr.mxu1 %v1121_v0 }
  0x31   :  { %853 = vmatpush3.msra.mxu0 %v1223_v42  ;;  %880 = vmatpush3.msra.mxu1 %v197_v19  ;;  %v258_v19 = vand.u32 4294901760, %v1324_v58  ;;  %v239_v37 = vand.u32 4294901760, %v238_v2  ;;  %v246_v44 = vand.u32 4294901760, %v245_v13 }
  0x32   :  { %854 = vmatprep.subr.mxu0 %v1121_v0  ;;  %881 = vmatprep.subr.mxu1 %v1121_v0 }
  0x33   :  { %855 = vmatpush3.msra.mxu0 %v1240_v49  ;;  %882 = vmatpush3.msra.mxu1 %v204_v34  ;;  %v144_v34 = vand.u32 4294901760, %v143_v61 }
  0x34   :  { %856 = vmatprep.subr.mxu0 %v1121_v0  ;;  %883 = vmatprep.subr.mxu1 %v1121_v0 }
  0x35   :  { %857 = vmatpush3.msra.mxu0 %v1259_v60  ;;  %884 = vmatpush3.msra.mxu1 %v211_v41  ;;  %v252_v41 = vsub.f32 %v1314_v51, %v251_v3 }
  0x36   :  { %858 = vmatprep.subr.mxu0 %v1121_v0  ;;  %885 = vmatprep.subr.mxu1 %v1121_v0 }
  0x37   :  { %859 = vmatpush3.msra.mxu0 %v1266_v63  ;;  %886 = vmatpush3.msra.mxu1 %v218_v52  ;;  %v259_v52 = vsub.f32 %v1324_v58, %v258_v19  ;;  %v253_v54 = vand.u32 4294901760, %v252_v41 }
  0x38   :  { %860 = vmatprep.subr.mxu0 %v1121_v0  ;;  %887 = vmatprep.subr.mxu1 %v1121_v0 }
  0x39   :  { %861 = vmatpush3.msra.mxu0 %v1283_v14  ;;  %888 = vmatpush3.msra.mxu1 %v225_v59  ;;  %v260_v59 = vand.u32 4294901760, %v259_v52 }
  0x3a   :  { %862 = vmatprep.subr.mxu0 %v1121_v0  ;;  %889 = vmatprep.subr.mxu1 %v1121_v0 }
  0x3b   :  { %863 = vmatpush3.msra.mxu0 %v1295_v33  ;;  %890 = vmatpush3.msra.mxu1 %v232_v8 }
  0x3c   :  { %891 = vmatprep.subr.mxu1 %v1121_v0  ;;  %902 = vmatprep.subr.mxu0 %v1121_v0 }
  0x3d   :  { %865 = vmatmul.mubr.f32.vlgmr.msra.gmra.mxu0 %v144_v34  ;;  %892 = vmatpush3.msra.mxu1 %v239_v37 }
  0x3e   :  { %903 = vmatpush3.msra.mxu0 %v1170_v15  ;;  %893 = vmatprep.subr.mxu1 %v1121_v0 }
  0x3f   :  { %904 = vmatprep.subr.mxu0 %v1121_v0  ;;  %894 = vmatpush3.msra.mxu1 %v246_v44 }
  0x40   :  { %905 = vmatpush3.msra.mxu0 %v1173_v16  ;;  %895 = vmatprep.subr.mxu1 %v1121_v0 }
  0x41   :  { %906 = vmatprep.subr.mxu0 %v1121_v0  ;;  %896 = vmatpush3.msra.mxu1 %v253_v54 }
  0x42   :  { %907 = vmatpush3.msra.mxu0 %v1178_v18  ;;  %897 = vmatprep.subr.mxu1 %v1121_v0 }
  0x43   :  { %908 = vmatprep.subr.mxu0 %v1121_v0  ;;  %898 = vmatpush3.msra.mxu1 %v260_v59 }
  0x44   :  { %909 = vmatpush3.msra.mxu0 %v1182_v20  ;;  %900 = vmatmul.mubr.f32.vlgmr.msra.gmra.mxu1 %v1268_v1 }
  0x45   :  { %910 = vmatprep.subr.mxu0 %v1121_v0  ;;  %937 = vmatprep.subr.mxu1 %v1121_v0 }
  0x46   :  { %911 = vmatpush3.msra.mxu0 %v1185_v21  ;;  %938 = vmatpush3.msra.mxu1 %v1156_v4 }
  0x47   :  { %912 = vmatprep.subr.mxu0 %v1121_v0  ;;  %939 = vmatprep.subr.mxu1 %v1121_v0 }
  0x48   :  { %913 = vmatpush3.msra.mxu0 %v1199_v30  ;;  %940 = vmatpush3.msra.mxu1 %v1158_v5  ;;  %v729_v30 = vld [vmem:[%s1525_s1] ss:$0 sm:$0xff] }
  0x49   :  { %914 = vmatprep.subr.mxu0 %v1121_v0  ;;  %941 = vmatprep.subr.mxu1 %v1121_v0 }
  0x4a   :  { %915 = vmatpush3.msra.mxu0 %v1212_v35  ;;  %942 = vmatpush3.msra.mxu1 %v1160_v6 }
  0x4b   :  { %916 = vmatprep.subr.mxu0 %v1121_v0  ;;  %943 = vmatprep.subr.mxu1 %v1121_v0 }
  0x4c   :  { %917 = vmatpush3.msra.mxu0 %v1226_v43  ;;  %944 = vmatpush3.msra.mxu1 %v1162_v10 }
  0x4d   :  { %918 = vmatprep.subr.mxu0 %v1121_v0  ;;  %945 = vmatprep.subr.mxu1 %v1121_v0 }
  0x4e   :  { %919 = vmatpush3.msra.mxu0 %v1234_v47  ;;  %946 = vmatpush3.msra.mxu1 %v1164_v11 }
  0x4f   :  { %920 = vmatprep.subr.mxu0 %v1121_v0  ;;  %947 = vmatprep.subr.mxu1 %v1121_v0 }
  0x50   :  { %921 = vmatpush3.msra.mxu0 %v1248_v55  ;;  %948 = vmatpush3.msra.mxu1 %v1166_v12 }
  0x51   :  { %922 = vmatprep.subr.mxu0 %v1121_v0  ;;  %949 = vmatprep.subr.mxu1 %v1121_v0 }
  0x52   :  { %923 = vmatpush3.msra.mxu0 %v1262_v62  ;;  %950 = vmatpush3.msra.mxu1 %v1175_v17 }
  0x53   :  { %924 = vmatprep.subr.mxu0 %v1121_v0  ;;  %951 = vmatprep.subr.mxu1 %v1121_v0 }
  0x54   :  { %925 = vmatpush3.msra.mxu0 %v1276_v9  ;;  %952 = vmatpush3.msra.mxu1 %v1191_v25 }
  0x55   :  { %926 = vmatprep.subr.mxu0 %v1121_v0  ;;  %953 = vmatprep.subr.mxu1 %v1121_v0 }
  0x56   :  { %927 = vmatpush3.msra.mxu0 %v1291_v32  ;;  %954 = vmatpush3.msra.mxu1 %v1195_v28 }
  0x57   :  { %928 = vmatprep.subr.mxu0 %v1121_v0  ;;  %955 = vmatprep.subr.mxu1 %v1121_v0 }
  0x58   :  { %929 = vmatpush3.msra.mxu0 %v1303_v39  ;;  %956 = vmatpush3.msra.mxu1 %v1215_v36 }
  0x59   :  { %930 = vmatprep.subr.mxu0 %v1121_v0  ;;  %957 = vmatprep.subr.mxu1 %v1121_v0 }
  0x5a   :  { %931 = vmatpush3.msra.mxu0 %v1314_v51  ;;  %958 = vmatpush3.msra.mxu1 %v1223_v42 }
  0x5b   :  { %932 = vmatprep.subr.mxu0 %v1121_v0  ;;  %959 = vmatprep.subr.mxu1 %v1121_v0 }
  0x5c   :  { %933 = vmatpush3.msra.mxu0 %v1324_v58  ;;  %934 = vmatprep.mubr.msk.f32.mxu0 %vm1122_vm0, %v1121_v0 }
  0x5d   :  { %960 = vmatpush3.msra.mxu1 %v1240_v49  ;;  %935 = vmatmul.mubr.f32.vlgmr.msra.gmra.mxu0 %v1288_v31 }
  0x5e   :  { %961 = vmatprep.subr.mxu1 %v1121_v0  ;;  %972 = vmatprep.subr.mxu0 %v1121_v0 }
  0x5f   :  { %962 = vmatpush3.msra.mxu1 %v1259_v60  ;;  %973 = vmatpush3.msra.mxu0 %v153_v22 }
  0x60   :  { %963 = vmatprep.subr.mxu1 %v1121_v0  ;;  %974 = vmatprep.subr.mxu0 %v1121_v0 }
  0x61   :  { %964 = vmatpush3.msra.mxu1 %v1266_v63  ;;  %975 = vmatpush3.msra.mxu0 %v160_v23 }
  0x62   :  { %965 = vmatprep.subr.mxu1 %v1121_v0  ;;  %976 = vmatprep.subr.mxu0 %v1121_v0 }
  0x63   :  { %966 = vmatpush3.msra.mxu1 %v1283_v14  ;;  %977 = vmatpush3.msra.mxu0 %v167_v24 }
  0x64   :  { %967 = vmatprep.subr.mxu1 %v1121_v0  ;;  %978 = vmatprep.subr.mxu0 %v1121_v0 }
  0x65   :  { %968 = vmatpush3.msra.mxu1 %v1295_v33  ;;  %969 = vmatprep.mubr.msk.f32.mxu1 %vm1122_vm0, %v1121_v0 }
  0x66   :  { %979 = vmatpush3.msra.mxu0 %v174_v27  ;;  %970 = vmatmul.mubr.f32.vlgmr.msra.gmra.mxu1 %v142_v45 }
  0x67   :  { %980 = vmatprep.subr.mxu0 %v1121_v0  ;;  %1007 = vmatprep.subr.mxu1 %v1121_v0 }
  0x68   :  { %981 = vmatpush3.msra.mxu0 %v181_v29  ;;  %1008 = vmatpush3.msra.mxu1 %v1156_v4 }
  0x69   :  { %982 = vmatprep.subr.mxu0 %v1121_v0  ;;  %1009 = vmatprep.subr.mxu1 %v1121_v0 }
  0x6a   :  { %983 = vmatpush3.msra.mxu0 %v188_v40  ;;  %1010 = vmatpush3.msra.mxu1 %v1158_v5 }
  0x6b   :  { %984 = vmatprep.subr.mxu0 %v1121_v0  ;;  %1011 = vmatprep.subr.mxu1 %v1121_v0 }
  0x6c   :  { %985 = vmatpush3.msra.mxu0 %v195_v46  ;;  %1012 = vmatpush3.msra.mxu1 %v1160_v6 }
  0x6d   :  { %986 = vmatprep.subr.mxu0 %v1121_v0  ;;  %1013 = vmatprep.subr.mxu1 %v1121_v0 }
  0x6e   :  { %987 = vmatpush3.msra.mxu0 %v202_v53  ;;  %1014 = vmatpush3.msra.mxu1 %v1162_v10 }
  0x6f   :  { %988 = vmatprep.subr.mxu0 %v1121_v0  ;;  %1015 = vmatprep.subr.mxu1 %v1121_v0 }
  0x70   :  { %989 = vmatpush3.msra.mxu0 %v209_v56  ;;  %1016 = vmatpush3.msra.mxu1 %v1164_v11 }
  0x71   :  { %990 = vmatprep.subr.mxu0 %v1121_v0  ;;  %1017 = vmatprep.subr.mxu1 %v1121_v0 }
  0x72   :  { %991 = vmatpush3.msra.mxu0 %v216_v7  ;;  %1018 = vmatpush3.msra.mxu1 %v1166_v12 }
  0x73   :  { %992 = vmatprep.subr.mxu0 %v1121_v0  ;;  %1019 = vmatprep.subr.mxu1 %v1121_v0 }
  0x74   :  { %993 = vmatpush3.msra.mxu0 %v223_v26  ;;  %1020 = vmatpush3.msra.mxu1 %v1175_v17 }
  0x75   :  { %994 = vmatprep.subr.mxu0 %v1121_v0  ;;  %1021 = vmatprep.subr.mxu1 %v1121_v0 }
  0x76   :  { %995 = vmatpush3.msra.mxu0 %v230_v38  ;;  %1022 = vmatpush3.msra.mxu1 %v1191_v25 }
  0x77   :  { %996 = vmatprep.subr.mxu0 %v1121_v0  ;;  %1023 = vmatprep.subr.mxu1 %v1121_v0 }
  0x78   :  { %997 = vmatpush3.msra.mxu0 %v237_v50  ;;  %1024 = vmatpush3.msra.mxu1 %v1195_v28 }
  0x79   :  { %998 = vmatprep.subr.mxu0 %v1121_v0  ;;  %1025 = vmatprep.subr.mxu1 %v1121_v0 }
  0x7a   :  { %999 = vmatpush3.msra.mxu0 %v244_v57  ;;  %1026 = vmatpush3.msra.mxu1 %v1215_v36 }
  0x7b   :  { %1000 = vmatprep.subr.mxu0 %v1121_v0  ;;  %1027 = vmatprep.subr.mxu1 %v1121_v0 }
  0x7c   :  { %1001 = vmatpush3.msra.mxu0 %v251_v3  ;;  %1028 = vmatpush3.msra.mxu1 %v1223_v42 }
  0x7d   :  { %1002 = vmatprep.subr.mxu0 %v1121_v0  ;;  %1029 = vmatprep.subr.mxu1 %v1121_v0 }
  0x7e   :  { %1003 = vmatpush3.msra.mxu0 %v258_v19  ;;  %1004 = vmatprep.mubr.msk.f32.mxu0 %vm1122_vm0, %v1121_v0 }
  0x7f   :  { %1030 = vmatpush3.msra.mxu1 %v1240_v49  ;;  %1005 = vmatmul.mubr.f32.vlgmr.msra.gmra.mxu0 %v1268_v1 }
  0x80   :  { %1031 = vmatprep.subr.mxu1 %v1121_v0  ;;  %1039 = vmatprep.mubr.msk.f32.mxu1 %vm1122_vm0, %v1121_v0 }
  0x81   :  { %1032 = vmatpush3.msra.mxu1 %v1259_v60 }
  0x82   :  { %1033 = vmatprep.subr.mxu1 %v1121_v0 }
  0x83   :  { %1034 = vmatpush3.msra.mxu1 %v1266_v63 }
  0x84   :  { %1035 = vmatprep.subr.mxu1 %v1121_v0 }
  0x85   :  { %1036 = vmatpush3.msra.mxu1 %v1283_v14 }
  0x86   :  { %1037 = vmatprep.subr.mxu1 %v1121_v0 }
  0x87   :  { %1038 = vmatpush3.msra.mxu1 %v1295_v33 }
  0x88   :  { %1040 = vmatmul.mubr.f32.vlgmr.msra.gmra.mxu1 %v1268_v1 }
  0xfd   :  { %v146_v4 = vpop.f32.mrf.mxu0 }
  0xff   :  { %v866_v5 = vpop.f32.mrf.mxu0 }
 0x104   :  { %v297_v6 = vpop.f32.mrf.mxu1 }
 0x105   :  { %v298_v18 = vadd.f32 %v297_v6, %v146_v4 }
 0x106   :  { %v901_v10 = vpop.f32.mrf.mxu1 }
 0x11d   :  { %v401_v11 = vpop.f32.mrf.mxu0 }
 0x11e   :  { %v402_v21 = vadd.f32 %v401_v11, %v298_v18 }
 0x11f   :  { %v936_v12 = vpop.f32.mrf.mxu0 }
 0x126   :  { %v490_v15 = vpop.f32.mrf.mxu1 }
 0x127   :  { %v491_v22 = vadd.f32 %v490_v15, %v402_v21 }
 0x128   :  { %v971_v16 = vpop.f32.mrf.mxu1 }
 0x13f   :  { %v609_v17 = vpop.f32.mrf.mxu0 }
 0x140   :  { %v610_v23 = vadd.f32 %v609_v17, %v491_v22 }
 0x141   :  { %v1006_v20 = vpop.f32.mrf.mxu0 }
 0x148   :  { %v696_v24 = vpop.f32.mrf.mxu1 }
 0x149   :  { %v697_v0 = vadd.f32 %v696_v24, %v610_v23 }
 0x14a   :  { %v1041_v25 = vpop.f32.mrf.mxu1 }
 0x14b   :  { %v700_v27 = vmul.f32 0.03125, %v697_v0 }
 0x14d   :  { %v701_v28 = vadd.f32 1e-05, %v700_v27 }
 0x14f   :  { %1049 = vrsqrt.f32 %v701_v28 }
 0x15c   :  { %v1050_v29 = vpop.eup %1049 }
 0x15d   :  { %v703_v35 = vmul.f32 %v1050_v29, %v1236_v48 }
 0x15f   :  { %v711_v36 = vmul.f32 %v729_v30, %v703_v35 }
 0x161   :  { %712 = vst [vmem:[#allocation7] sm:$0xff] %v711_v36 }
 0x162   :  { %1102 = shalt.err (!%p1099_p0)
}
 0x163   :  { %722 = dma.vmem_to_hbm [thread:$0]  %s720_s25, 128, %s1527_s3, [#allocation4]  }
 0x164   :  { %1115 = dma.done.wait [#allocation4], 128  }
 0x165   :  { %1116 = vsyncadd [#allocation4], 4294967168 }
 0x166   :  { %726 = vsyncpa [#allocation3], 1 }
 0x167   :  { %727 = vsyncpa [#allocation6], 1 }
 0x168   :  { %728 = vsyncpa [#allocation4], 1 }

</bundles_post_ra>
